<compile_context>
chip_gen: v7x
topology: tpu7x:2x2x1
jax: 0.10.0
libtpu: 0.0.40
codegen_flags: <defaults>
</compile_context>

<pallas_src>
import functools

import jax
import jax.numpy as jnp
from jax.experimental import pallas as pl
from jax.experimental.pallas import tpu as pltpu


def _round_up(x, m):
    return -(-x // m) * m


def _is_dual_tensorcore():
    """True only on chips with 2 TensorCores (v7x); v5e/v6e return False."""
    try:
        kind = jax.devices()[0].device_kind.lower()
    except Exception:
        return False
    return "v7" in kind


def _ce_distill_kernel(out_ref, tgt_ref, psum_ref, acc_ref, *,
                       inv_temperature, n_rows, block_rows, blocks_per_split):
    """One (block_rows, C) tile: per-row soft cross entropy, accumulated per split."""
    p = pl.program_id(0)          # split index (parallel axis)
    i = pl.program_id(1)          # row-block index within the split (accumulation)

    @pl.when(i == 0)
    def _():
        acc_ref[...] = jnp.zeros_like(acc_ref)

    inv_t = jnp.float32(inv_temperature)

    # Raw logits (cast once to f32); 1/T is folded into the exp arguments so we
    # never materialize separately scaled copies of the inputs.
    o = out_ref[...].astype(jnp.float32)                      # (TN, C)
    t = tgt_ref[...].astype(jnp.float32)                      # (TN, C)

    # logsumexp(outputs / T) along the class axis (max taken on raw values).
    o_max = jnp.max(o, axis=1, keepdims=True)                 # (TN, 1)
    lse = jnp.log(jnp.sum(jnp.exp((o - o_max) * inv_t), axis=1, keepdims=True))

    # softmax(targets / T) fused into the row reduction: the normalization is
    # applied to the (TN, 1) cross term with an exact divide, not to a (TN, C)
    # softmax tensor.
    t_max = jnp.max(t, axis=1, keepdims=True)                 # (TN, 1)
    t_exp = jnp.exp((t - t_max) * inv_t)                      # (TN, C)
    denom = jnp.sum(t_exp, axis=1, keepdims=True)             # (TN, 1)
    cross = jnp.sum(t_exp * o, axis=1, keepdims=True)         # (TN, 1)

    # -(softmax(t/T) * log_softmax(o/T)).sum(1)
    #   = (o_max/T + lse) - (1/T) * sum_j softmax(t/T)_j * o_j
    per_row = inv_t * (o_max - cross / denom) + lse           # (TN, 1)

    # Mask rows past the true row count (edge blocks / clamped dead blocks).
    # Mask AFTER computing per_row so garbage/NaN in padded rows is discarded.
    row0 = (p * blocks_per_split + i) * block_rows
    row_idx = row0 + jax.lax.broadcasted_iota(jnp.int32, (block_rows, 1), 0)
    per_row = jnp.where(row_idx < n_rows, per_row, 0.0)

    acc_ref[...] += per_row

    @pl.when(i == pl.num_programs(1) - 1)
    def _():
        total = jnp.sum(acc_ref[...])
        # Lane-dense (8, 128) output slab per split; wrapper reads [p, 0, 0].
        psum_ref[...] = jnp.zeros(psum_ref.shape, jnp.float32) + total


def ce_distill(outputs, targets, temperature, *, block_rows=None):
    """-(log_softmax(outputs/T, 1) * softmax(targets/T, 1)).sum(1).mean()"""
    assert outputs.shape == targets.shape and outputs.ndim == 2
    n, c = outputs.shape
    itemsize = jnp.dtype(outputs.dtype).itemsize
    sublane = {4: 8, 2: 16, 1: 32}.get(itemsize, 8)

    if block_rows is None:
        # VMEM byte budget per grid step, counting:
        #   * 2 inputs x 2 pipeline buffers in the input dtype,
        #   * ~6 block-sized f32 elementwise/exp temporaries,
        #   * ~1 KiB/row of lane-padded (rows, 1) column temporaries/scratch.
        budget = 12 * 1024 * 1024
        bytes_per_row = 2 * 2 * c * itemsize + 6 * c * 4 + 1024
        br = max(1, budget // bytes_per_row)
    else:
        br = block_rows
    br = min(br, _round_up(n, sublane))
    block_rows = max(sublane, (br // sublane) * sublane)

    n_blocks = -(-n // block_rows)
    # Split the row slabs across TensorCores only where a second core exists.
    num_splits = 2 if (_is_dual_tensorcore() and n_blocks >= 2) else 1
    blocks_per_split = -(-n_blocks // num_splits)

    kernel = functools.partial(
        _ce_distill_kernel,
        inv_temperature=1.0 / float(temperature),
        n_rows=n,
        block_rows=block_rows,
        blocks_per_split=blocks_per_split,
    )

    def row_block(p, i):
        blk = p * blocks_per_split + i
        # Clamp fully out-of-range blocks (odd block count on a 2-way split)
        # onto a valid block; their contribution is zeroed by the row mask.
        return (jnp.minimum(blk, n_blocks - 1), 0)

    partials = pl.pallas_call(
        kernel,
        out_shape=jax.ShapeDtypeStruct((num_splits, 8, 128), jnp.float32),
        grid_spec=pltpu.PrefetchScalarGridSpec(
            num_scalar_prefetch=0,
            grid=(num_splits, blocks_per_split),
            in_specs=[
                pl.BlockSpec((block_rows, c), row_block),
                pl.BlockSpec((block_rows, c), row_block),
            ],
            out_specs=pl.BlockSpec((1, 8, 128), lambda p, i: (p, 0, 0)),
            scratch_shapes=[pltpu.VMEM((block_rows, 1), jnp.float32)],
        ),
        compiler_params=pltpu.CompilerParams(
            dimension_semantics=("parallel", "arbitrary"),
            vmem_limit_bytes=32 * 1024 * 1024,
        ),
    )(outputs, targets)

    return jnp.sum(partials[:, 0, 0]) / jnp.float32(n)


def _ce_distill_ref(outputs, targets, temperature):
    log_sm = jax.nn.log_softmax(outputs.astype(jnp.float32) / temperature, axis=1)
    sm_t = jax.nn.softmax(targets.astype(jnp.float32) / temperature, axis=1)
    return -(log_sm * sm_t).sum(axis=1).mean()


if __name__ == "__main__":
    temperature = 3.0
    key = jax.random.PRNGKey(0)

    checks = [
        # (n, c, block_rows override, dtype)
        (16, 128, None, jnp.float32),   # single full block, auto tile size
        (13, 128, None, jnp.float32),   # ragged rows -> edge block + mask (no pad)
        (37, 128, 8, jnp.float32),      # many blocks -> accumulation + ragged tail
        (40, 96, 16, jnp.float32),      # class dim not a multiple of 128
        (48, 128, None, jnp.bfloat16),  # low-precision inputs (sublane=16 path)
    ]
    for idx, (n, c, br, dt) in enumerate(checks):
        k1, k2 = jax.random.split(jax.random.fold_in(key, idx))
        outputs = jax.random.normal(k1, (n, c), dtype=jnp.float32).astype(dt)
        targets = jax.random.normal(k2, (n, c), dtype=jnp.float32).astype(dt)

        loss = jax.block_until_ready(
            ce_distill(outputs, targets, temperature, block_rows=br))
        ref = _ce_distill_ref(outputs, targets, temperature)

        tol = 1e-3 if dt == jnp.bfloat16 else 2e-5
        assert jnp.allclose(loss, ref, rtol=tol, atol=tol), (n, c, dt, loss, ref)

    print("KERNEL_OK")
</pallas_src>

<mosaic_0001>
module attributes {stable_mosaic.version = 11 : i64} {
  func.func @_ce_distill_kernel(%arg0: i32, %arg1: i32, %arg2: memref<16x128xf32, #tpu.memory_space<vmem>>, %arg3: memref<16x128xf32, #tpu.memory_space<vmem>>, %arg4: memref<1x8x128xf32, #tpu.memory_space<vmem>>, %arg5: memref<16x1xf32, #tpu.memory_space<vmem>>) attributes {dimension_semantics = [#tpu.dimension_semantics<parallel>, #tpu.dimension_semantics<arbitrary>], iteration_bounds = array<i64: 1, 1>, scalar_prefetch = 0 : i64, scratch_operands = 1 : i64, tpu.core_type = #tpu.core_type<tc>, window_params = [{transform_indices = @transform_0, window_bounds = array<i64: 16, 128>}, {transform_indices = @transform_1, window_bounds = array<i64: 16, 128>}, {transform_indices = @transform_2, window_bounds = array<i64: 1, 8, 128>}]} {
    %c0_i32 = arith.constant 0 : i32
    %0 = arith.cmpi eq, %arg1, %c0_i32 : i32
    %1 = arith.extui %0 : i1 to i32
    %c0_i32_0 = arith.constant 0 : i32
    %2 = arith.cmpi ne, %1, %c0_i32_0 : i32
    scf.if %2 {
      %cst_19 = arith.constant 0.000000e+00 : f32
      %48 = vector.broadcast %cst_19 : f32 to vector<16x1xf32>
      %c0_20 = arith.constant 0 : index
      %c0_21 = arith.constant 0 : index
      %49 = vector.load %arg5[%c0_20, %c0_21] : memref<16x1xf32, #tpu.memory_space<vmem>>, vector<16x1xf32>
      tpu.vector_store %arg5[%c0_20, %c0_21], %48 {strides = array<i32>} : memref<16x1xf32, #tpu.memory_space<vmem>>, vector<16x1xf32>,
    } else {
    }
    %c0 = arith.constant 0 : index
    %c0_1 = arith.constant 0 : index
    %3 = vector.load %arg2[%c0, %c0_1] : memref<16x128xf32, #tpu.memory_space<vmem>>, vector<16x128xf32>
    %c0_2 = arith.constant 0 : index
    %c0_3 = arith.constant 0 : index
    %4 = vector.load %arg3[%c0_2, %c0_3] : memref<16x128xf32, #tpu.memory_space<vmem>>, vector<16x128xf32>
    %cst = arith.constant dense<0xFF800000> : vector<16xf32>
    %5 = vector.multi_reduction <maximumf>, %3, %cst [1] : vector<16x128xf32> to vector<16xf32>
    %6 = vector.shape_cast %5 : vector<16xf32> to vector<16x1xf32>
    %7 = vector.broadcast %6 : vector<16x1xf32> to vector<16x128xf32>
    %8 = arith.subf %3, %7 : vector<16x128xf32>
    %cst_4 = arith.constant 0.333333343 : f32
    %9 = vector.broadcast %cst_4 : f32 to vector<16x128xf32>
    %10 = arith.mulf %8, %9 : vector<16x128xf32>
    %11 = math.exp %10 : vector<16x128xf32>
    %cst_5 = arith.constant dense<0.000000e+00> : vector<16xf32>
    %12 = vector.multi_reduction <add>, %11, %cst_5 [1] : vector<16x128xf32> to vector<16xf32>
    %13 = vector.shape_cast %12 : vector<16xf32> to vector<16x1xf32>
    %14 = math.log %13 : vector<16x1xf32>
    %cst_6 = arith.constant dense<0xFF800000> : vector<16xf32>
    %15 = vector.multi_reduction <maximumf>, %4, %cst_6 [1] : vector<16x128xf32> to vector<16xf32>
    %16 = vector.shape_cast %15 : vector<16xf32> to vector<16x1xf32>
    %17 = vector.broadcast %16 : vector<16x1xf32> to vector<16x128xf32>
    %18 = arith.subf %4, %17 : vector<16x128xf32>
    %cst_7 = arith.constant 0.333333343 : f32
    %19 = vector.broadcast %cst_7 : f32 to vector<16x128xf32>
    %20 = arith.mulf %18, %19 : vector<16x128xf32>
    %21 = math.exp %20 : vector<16x128xf32>
    %cst_8 = arith.constant dense<0.000000e+00> : vector<16xf32>
    %22 = vector.multi_reduction <add>, %21, %cst_8 [1] : vector<16x128xf32> to vector<16xf32>
    %23 = vector.shape_cast %22 : vector<16xf32> to vector<16x1xf32>
    %24 = arith.mulf %21, %3 : vector<16x128xf32>
    %cst_9 = arith.constant dense<0.000000e+00> : vector<16xf32>
    %25 = vector.multi_reduction <add>, %24, %cst_9 [1] : vector<16x128xf32> to vector<16xf32>
    %26 = vector.shape_cast %25 : vector<16xf32> to vector<16x1xf32>
    %27 = arith.divf %26, %23 : vector<16x1xf32>
    %28 = arith.subf %6, %27 : vector<16x1xf32>
    %cst_10 = arith.constant 0.333333343 : f32
    %29 = vector.broadcast %cst_10 : f32 to vector<16x1xf32>
    %30 = arith.mulf %29, %28 : vector<16x1xf32>
    %31 = arith.addf %30, %14 : vector<16x1xf32>
    %c1_i32 = arith.constant 1 : i32
    %32 = arith.muli %arg0, %c1_i32 : i32
    %33 = arith.addi %32, %arg1 : i32
    %c16_i32 = arith.constant 16 : i32
    %34 = arith.muli %33, %c16_i32 : i32
    %35 = tpu.iota {dimensions = array<i32: 0>} : vector<16x1xi32>
    %36 = vector.broadcast %34 : i32 to vector<16x1xi32>
    %37 = arith.addi %36, %35 : vector<16x1xi32>
    %c16_i32_11 = arith.constant 16 : i32
    %38 = vector.broadcast %c16_i32_11 : i32 to vector<16x1xi32>
    %39 = arith.cmpi slt, %37, %38 : vector<16x1xi32>
    %cst_12 = arith.constant 0.000000e+00 : f32
    %40 = vector.broadcast %cst_12 : f32 to vector<16x1xf32>
    %41 = arith.select %39, %31, %40 : vector<16x1xi1>, vector<16x1xf32>
    %c0_13 = arith.constant 0 : index
    %c0_14 = arith.constant 0 : index
    %42 = vector.load %arg5[%c0_13, %c0_14] : memref<16x1xf32, #tpu.memory_space<vmem>>, vector<16x1xf32>
    %43 = arith.addf %42, %41 : vector<16x1xf32>
    %c0_15 = arith.constant 0 : index
    %c0_16 = arith.constant 0 : index
    %44 = vector.load %arg5[%c0_15, %c0_16] : memref<16x1xf32, #tpu.memory_space<vmem>>, vector<16x1xf32>
    tpu.vector_store %arg5[%c0_15, %c0_16], %43 {strides = array<i32>} : memref<16x1xf32, #tpu.memory_space<vmem>>, vector<16x1xf32>,
    %c0_i32_17 = arith.constant 0 : i32
    %45 = arith.cmpi eq, %arg1, %c0_i32_17 : i32
    %46 = arith.extui %45 : i1 to i32
    %c0_i32_18 = arith.constant 0 : i32
    %47 = arith.cmpi ne, %46, %c0_i32_18 : i32
    scf.if %47 {
      %c0_19 = arith.constant 0 : index
      %c0_20 = arith.constant 0 : index
      %48 = vector.load %arg5[%c0_19, %c0_20] : memref<16x1xf32, #tpu.memory_space<vmem>>, vector<16x1xf32>
      %49 = vector.shape_cast %48 : vector<16x1xf32> to vector<1x16x1xf32>
      %cst_21 = arith.constant dense<0.000000e+00> : vector<1xf32>
      %50 = vector.multi_reduction <add>, %49, %cst_21 [1, 2] : vector<1x16x1xf32> to vector<1xf32>
      %51 = vector.shape_cast %50 : vector<1xf32> to vector<1x1x1xf32>
      %52 = vector.extract %51[0, 0, 0] : f32 from vector<1x1x1xf32>
      %cst_22 = arith.constant 0.000000e+00 : f32
      %53 = vector.broadcast %cst_22 : f32 to vector<1x8x128xf32>
      %54 = vector.broadcast %52 : f32 to vector<1x8x128xf32>
      %55 = arith.addf %53, %54 : vector<1x8x128xf32>
      %c0_23 = arith.constant 0 : index
      %c0_24 = arith.constant 0 : index
      %c0_25 = arith.constant 0 : index
      %56 = vector.load %arg4[%c0_23, %c0_24, %c0_25] : memref<1x8x128xf32, #tpu.memory_space<vmem>>, vector<1x8x128xf32>
      tpu.vector_store %arg4[%c0_23, %c0_24, %c0_25], %55 {strides = array<i32>} : memref<1x8x128xf32, #tpu.memory_space<vmem>>, vector<1x8x128xf32>,
    } else {
    }
    return
  }
  func.func @transform_0(%arg0: i32, %arg1: i32) -> (i32, i32) {
    %c1_i32 = arith.constant 1 : i32
    %0 = arith.muli %arg0, %c1_i32 : i32
    %1 = arith.addi %0, %arg1 : i32
    %c0_i32 = arith.constant 0 : i32
    %2 = arith.minsi %1, %c0_i32 : i32
    %c0_i32_0 = arith.constant 0 : i32
    %c0_i32_1 = arith.constant 0 : i32
    return %2, %c0_i32_0 : i32, i32
  }
  func.func @transform_1(%arg0: i32, %arg1: i32) -> (i32, i32) {
    %c1_i32 = arith.constant 1 : i32
    %0 = arith.muli %arg0, %c1_i32 : i32
    %1 = arith.addi %0, %arg1 : i32
    %c0_i32 = arith.constant 0 : i32
    %2 = arith.minsi %1, %c0_i32 : i32
    %c0_i32_0 = arith.constant 0 : i32
    %c0_i32_1 = arith.constant 0 : i32
    return %2, %c0_i32_0 : i32, i32
  }
  func.func @transform_2(%arg0: i32, %arg1: i32) -> (i32, i32, i32) {
    %c0_i32 = arith.constant 0 : i32
    %c0_i32_0 = arith.constant 0 : i32
    %c0_i32_1 = arith.constant 0 : i32
    return %arg0, %c0_i32, %c0_i32_0 : i32, i32, i32
  }
}

</mosaic_0001>

<bundles_post_ra>
// kernel: tpu_custom_call.1
= control target key start
LH: loop header
LB: loop body
LE: loop exit
PB: predicated region body
PF: predicated region fallthrough
CT: control target
= control target key end

     0   :  { %7 = vsyncpa [#allocation4], 0  ;;  %s341_s0 = inlined_call_operand.hbm [shape: f32[16,128], index: 0, kind: input, shape index: {}]   ;;  %s342_s1 = inlined_call_operand.hbm [shape: f32[16,128], index: 1, kind: input, shape index: {}]   ;;  %s343_s2 = inlined_call_operand.hbm [shape: f32[1,8,128], index: 2, kind: output, shape index: {}]  }
   0x1   :  { %8 = vsyncpa [#allocation7], 0 }
   0x2   :  { %9 = vsyncpa [#allocation5], 0  ;;  %s278_s9 = smov [#allocation3]   ;;  %s206_s13 = scalar_lea.hbm %s341_s0, 256 }
   0x3   :  { %s21_s10 = sshll.u32 %s278_s9, 4  ;;  %p207_p0 = scmp.ne.s32.totalorder %s341_s0, %s206_s13  ;;  %s22_s10 = int_to_ptr.vmem [resolvable:$true] %s21_s10 }
   0x4   :  { %p210_p1 = scmp.lt.u32.totalorder %s206_s13, %s341_s0 }
   0x6   :  { %p212_p2 = pnand %p210_p1, %p207_p0 }
   0x8   :  { %215 = shalt.err (!%p212_p2)
}
   0x9   :  { %s216_s18 = scalar_lea.vmem %s22_s10, 256  ;;  %p221_p4 = scmp.lt.s32.totalorder %s22_s10, %s22_s10 }
   0xa   :  { %p217_p3 = scmp.ne.s32.totalorder %s22_s10, %s216_s18  ;;  %p222_p5 = scmp.lt.s32.totalorder %s216_s18, %s216_s18 }
   0xc   :  { %p223_p6 = por %p222_p5, %p221_p4 }
   0xe   :  { %p224_p7 = pnand %p223_p6, %p217_p3 }
  0x10   :  { %227 = shalt.err (!%p224_p7)
}
  0x11   :  { %s279_s19 = smov 128   ;;  %s280_s20 = smov 8  }
  0x12   :  { %27 = dma.hbm_to_vmem [thread:$0]  %s341_s0, 256, %s22_s10, [#allocation4], %s279_s19, %s279_s19, %s280_s20  }
  0x13   :  { %s281_s23 = smov [#allocation6]   ;;  %s228_s27 = scalar_lea.hbm %s342_s1, 256 }
  0x14   :  { %s39_s24 = sshll.u32 %s281_s23, 4  ;;  %p229_p8 = scmp.ne.s32.totalorder %s342_s1, %s228_s27  ;;  %s40_s24 = int_to_ptr.vmem [resolvable:$true] %s39_s24 }
  0x15   :  { %p232_p9 = scmp.lt.u32.totalorder %s228_s27, %s342_s1 }
  0x17   :  { %p234_p10 = pnand %p232_p9, %p229_p8 }
  0x19   :  { %237 = shalt.err (!%p234_p10)
}
  0x1a   :  { %s238_s4 = scalar_lea.vmem %s40_s24, 256  ;;  %p243_p12 = scmp.lt.s32.totalorder %s40_s24, %s40_s24 }
  0x1b   :  { %p239_p11 = scmp.ne.s32.totalorder %s40_s24, %s238_s4  ;;  %p244_p13 = scmp.lt.s32.totalorder %s238_s4, %s238_s4 }
  0x1d   :  { %p245_p0 = por %p244_p13, %p243_p12 }
  0x1f   :  { %p246_p1 = pnand %p245_p0, %p239_p11 }
  0x21   :  { %249 = shalt.err (!%p246_p1)
}
  0x22   :  { %45 = dma.hbm_to_vmem [thread:$0]  %s342_s1, 256, %s40_s24, [#allocation7], %s279_s19, %s279_s19, %s280_s20  }
  0x23   :  { %272 = dma.done.wait [#allocation4], 256  }
  0x24   :  { %273 = vsyncadd [#allocation4], 4294967040 }
  0x25   :  { %274 = dma.done.wait [#allocation7], 256  }
  0x26   :  { %275 = vsyncadd [#allocation7], 4294967040  ;;  %v69_v0 = vld [vmem:[#allocation6] sm:$0xff]  ;;  %v67_v1 = vld [vmem:[#allocation3] sm:$0xff]  ;;  %vm64_vm0 = vcmask 7168   ;;  %v282_v26 = vmov 0.0  }
  0x27   :  { %91 = vmax.xlane.f32.xlu0 %v69_v0  ;;  %71 = vmax.xlane.f32.xlu1 %v67_v1  ;;  %v70_v2 = vld [vmem:[#allocation6 + $0x8] sm:$0xff]  ;;  %v68_v3 = vld [vmem:[#allocation3 + $0x8] sm:$0xff]  ;;  %65 = vst.msk [vmem:[#allocation2] sm:$0xff] %vm64_vm0, %v282_v26  ;;  %66 = vst.msk [vmem:[#allocation2 + $0x8] sm:$0xff] %vm64_vm0, %v282_v26  ;;  %s283_s1 = smov [#allocation8]  }
  0x28   :  { %s168_s6 = sshll.u32 %s283_s1, 4  ;;  %s169_s6 = int_to_ptr.vmem [resolvable:$true] %s168_s6 }
  0x29   :  { %s250_s8 = scalar_lea.vmem %s169_s6, 128  ;;  %p255_p3 = scmp.lt.s32.totalorder %s169_s6, %s169_s6 }
  0x2a   :  { %p251_p2 = scmp.ne.s32.totalorder %s169_s6, %s250_s8  ;;  %p256_p4 = scmp.lt.s32.totalorder %s250_s8, %s250_s8 }
  0x2b   :  { %93 = vmax.xlane.f32.xlu0 %v70_v2  ;;  %73 = vmax.xlane.f32.xlu1 %v68_v3 }
  0x2c   :  { %p257_p5 = por %p256_p4, %p255_p3 }
  0x2e   :  { %v135_v40 = vld [vmem:[#allocation2] sm:$0xff]  ;;  %v136_v48 = vld [vmem:[#allocation2 + $0x8] sm:$0xff]  ;;  %p258_p6 = pnand %p257_p5, %p251_p2 }
  0xb4   :  { %v92_v4 = vpop.xlane.xlu0 %91  ;;  %v72_v5 = vpop.xlane.xlu1 %71 }
  0xb5   :  { %v95_v6 = vsub.f32 %v69_v0, %v92_v4  ;;  %v75_v7 = vsub.f32 %v67_v1, %v72_v5 }
  0xb7   :  { %v97_v8 = vmul.f32 0.33333334, %v95_v6  ;;  %v77_v9 = vmul.f32 0.33333334, %v75_v7 }
  0xb8   :  { %v94_v10 = vpop.xlane.xlu0 %93  ;;  %v74_v11 = vpop.xlane.xlu1 %73 }
  0xb9   :  { %v99_v12 = vmul.f32 1.442695, %v97_v8  ;;  %v96_v13 = vsub.f32 %v70_v2, %v94_v10  ;;  %v79_v14 = vmul.f32 1.442695, %v77_v9  ;;  %v76_v15 = vsub.f32 %v68_v3, %v74_v11 }
  0xbb   :  { %190 = vpow2.f32 %v99_v12  ;;  %v98_v16 = vmul.f32 0.33333334, %v96_v13  ;;  %v78_v17 = vmul.f32 0.33333334, %v76_v15 }
  0xbc   :  { %192 = vpow2.f32 %v79_v14 }
  0xbd   :  { %v101_v18 = vmul.f32 1.442695, %v98_v16  ;;  %v81_v19 = vmul.f32 1.442695, %v78_v17 }
  0xbf   :  { %194 = vpow2.f32 %v101_v18 }
  0xc0   :  { %196 = vpow2.f32 %v81_v19 }
  0xc5   :  { %v191_v20 = vpop.eup %190 }
  0xc6   :  { %103 = vadd.xlane.f32.xlu0 %v191_v20  ;;  %v193_v21 = vpop.eup %192  ;;  %v107_v24 = vmul.f32 %v191_v20, %v67_v1 }
  0xc9   :  { %v195_v22 = vpop.eup %194 }
  0xca   :  { %105 = vadd.xlane.f32.xlu1 %v195_v22  ;;  %83 = vadd.xlane.f32.xlu0 %v193_v21  ;;  %v197_v23 = vpop.eup %196  ;;  %v108_v25 = vmul.f32 %v195_v22, %v68_v3 }
  0xce   :  { %85 = vadd.xlane.f32.xlu1 %v197_v23  ;;  %109 = vadd.xlane.f32.xlu0 %v107_v24 }
  0xd2   :  { %111 = vadd.xlane.f32.xlu1 %v108_v25 }
 0x153   :  { %v104_v27 = vpop.xlane.xlu0 %103 }
 0x154   :  { %198 = vrcp.f32 %v104_v27 }
 0x157   :  { %v84_v28 = vpop.xlane.xlu0 %83  ;;  %v106_v29 = vpop.xlane.xlu1 %105 }
 0x158   :  { %200 = vlog2.f32 %v84_v28 }
 0x159   :  { %202 = vrcp.f32 %v106_v29 }
 0x15b   :  { %v86_v30 = vpop.xlane.xlu1 %85  ;;  %v110_v32 = vpop.xlane.xlu0 %109 }
 0x15c   :  { %204 = vlog2.f32 %v86_v30 }
 0x15e   :  { %v199_v31 = vpop.eup %198 }
 0x15f   :  { %v114_v33 = vmul.f32 %v199_v31, %v110_v32  ;;  %v112_v39 = vpop.xlane.xlu1 %111 }
 0x161   :  { %v117_v34 = vsub.f32 %v72_v5, %v114_v33 }
 0x162   :  { %v201_v35 = vpop.eup %200 }
 0x163   :  { %v203_v36 = vpop.eup %202  ;;  %v88_v37 = vmul.f32 0.6931472, %v201_v35  ;;  %v119_v38 = vmul.f32 0.33333334, %v117_v34 }
 0x164   :  { %v116_v41 = vmul.f32 %v203_v36, %v112_v39 }
 0x165   :  { %v121_v42 = vadd.f32 %v119_v38, %v88_v37 }
 0x166   :  { %v205_v43 = vpop.eup %204  ;;  %v118_v44 = vsub.f32 %v74_v11, %v116_v41 }
 0x167   :  { %v90_v45 = vmul.f32 0.6931472, %v205_v43  ;;  %v137_v46 = vadd.f32 %v135_v40, %v121_v42 }
 0x168   :  { %v120_v47 = vmul.f32 0.33333334, %v118_v44 }
 0x169   :  { %140 = vst.msk [vmem:[#allocation2] sm:$0xff] %vm64_vm0, %v137_v46 }
 0x16a   :  { %v122_v49 = vadd.f32 %v120_v47, %v90_v45 }
 0x16c   :  { %v138_v50 = vadd.f32 %v136_v48, %v122_v49 }
 0x16e   :  { %141 = vst.msk [vmem:[#allocation2 + $0x8] sm:$0xff] %vm64_vm0, %v138_v50 }
 0x170   :  { %v145_v51 = vld [vmem:[#allocation2] sm:$0xff] }
 0x171   :  { %v147_v53 = vsel %vm64_vm0, %v145_v51, 0.0 }
 0x175   :  { %v146_v52 = vld [vmem:[#allocation2 + $0x8] sm:$0xff] }
 0x176   :  { %v148_v54 = vsel %vm64_vm0, %v146_v52, 0.0 }
 0x177   :  { %v149_v55 = vadd.f32 %v148_v54, %v147_v53 }
 0x179   :  { %150 = vadd.xlane.f32.xlu0 %v149_v55 }
 0x206   :  { %v151_v56 = vpop.xlane.xlu0 %150 }
 0x207   :  { %v152_v57 = vrot.slane %v151_v56, 4 }
 0x209   :  { %v153_v58 = vadd.f32 %v152_v57, %v151_v56 }
 0x20b   :  { %v154_v59 = vrot.slane %v153_v58, 2 }
 0x20d   :  { %v155_v60 = vadd.f32 %v154_v59, %v153_v58 }
 0x20f   :  { %v156_v61 = vrot.slane %v155_v60, 1 }
 0x211   :  { %v157_v62 = vadd.f32 %v156_v61, %v155_v60 }
 0x213   :  { %182 = vpush %v157_v62 }
 0x244   :  { %s183_s7 = spop %182 }
 0x245   :  { %v159_v63 = vstv %s183_s7 }
 0x246   :  { %161 = vst [vmem:[#allocation8] sm:$0xff] %v159_v63 }
 0x247   :  { %261 = shalt.err (!%p258_p6)
}
 0x248   :  { %s262_s11 = scalar_lea.hbm %s343_s2, 128 }
 0x249   :  { %p263_p7 = scmp.ne.s32.totalorder %s343_s2, %s262_s11  ;;  %p266_p8 = scmp.lt.u32.totalorder %s262_s11, %s343_s2 }
 0x24b   :  { %p268_p9 = pnand %p266_p8, %p263_p7 }
 0x24d   :  { %271 = shalt.err (!%p268_p9)
}
 0x24e   :  { %171 = dma.vmem_to_hbm [thread:$0]  %s169_s6, 128, %s343_s2, [#allocation5]  }
 0x24f   :  { %276 = dma.done.wait [#allocation5], 128  }
 0x250   :  { %277 = vsyncadd [#allocation5], 4294967168 }
 0x251   :  { %175 = vsyncpa [#allocation4], 1 }
 0x252   :  { %176 = vsyncpa [#allocation7], 1 }
 0x253   :  { %177 = vsyncpa [#allocation5], 1 }

</bundles_post_ra>
